<compile_context>
chip_gen: v5e
topology: v5e:2x2
jax: 0.10.0
libtpu: 0.0.40
codegen_flags: <defaults>
</compile_context>

<pallas_src>
import functools

import jax
import jax.numpy as jnp
from jax.experimental import pallas as pl
from jax.experimental.pallas import tpu as pltpu


def _mlp_kernel(w1_ref, b1_ref, w2_ref, b2_ref, x_ref, o_ref):
    # x_ref: (3, TR, 128) sublane+lane dense batch slab; o_ref: (TR, 128).
    # Weights/biases are SMEM-resident scalars (PyTorch layout: w1 is (out, in)).
    x0 = x_ref[0]            # (TR, 128) f32
    x1 = x_ref[1]
    x2 = x_ref[2]

    # linear1 + ReLU, fully unrolled on the VPU: h_j = relu(sum_i x_i * w1[j,i] + b1[j])
    h0 = jnp.maximum(x0 * w1_ref[0, 0] + x1 * w1_ref[0, 1] + x2 * w1_ref[0, 2] + b1_ref[0], 0.0)
    h1 = jnp.maximum(x0 * w1_ref[1, 0] + x1 * w1_ref[1, 1] + x2 * w1_ref[1, 2] + b1_ref[1], 0.0)
    h2 = jnp.maximum(x0 * w1_ref[2, 0] + x1 * w1_ref[2, 1] + x2 * w1_ref[2, 2] + b1_ref[2], 0.0)

    # linear2: y = sum_j h_j * w2[j] + b2  -> one wide, unmasked (TR, 128) store.
    y = h0 * w2_ref[0] + h1 * w2_ref[1] + h2 * w2_ref[2] + b2_ref[0]
    o_ref[...] = y.astype(o_ref.dtype)


def _choose_block_rows(R, max_rows, min_steps=4):
    """Pick the per-step row tile TR (rows of 128 lanes each)."""
    max_rows = max(8, (max_rows // 8) * 8)      # defensively a multiple of 8
    if R <= 8:
        return R                                # single block == full array dim (valid)
    if R > max_rows:
        return max_rows
    # Enough rows to tile: leave ~min_steps grid steps for megacore, TR % 8 == 0.
    tr = -(-R // min_steps)
    tr = ((tr + 7) // 8) * 8
    return max(8, min(tr, max_rows))


@functools.partial(jax.jit, static_argnames=("block_rows",))
def simple_net_forward(x, w1, b1, w2, b2, *, block_rows=512):
    """Forward pass of SimpleNet.

    x  : (B, 3)  float32
    w1 : (3, 3)  float32  (PyTorch layout: out x in)
    b1 : (3,)    float32
    w2 : (1, 3)  float32  (PyTorch layout: out x in)
    b2 : (1,)    float32
    returns (B, 1) float32
    """
    B = x.shape[0]
    R = -(-B // 128)                            # rows of 128 lanes
    B_pad = R * 128

    # Feature-major, sublane+lane dense layout (3, R, 128).  Under jit the
    # transpose + pad + reshape fuse into one HBM pass (no separate pad copy).
    xt = x.astype(jnp.float32).T                # (3, B)
    if B_pad != B:
        xt = jnp.pad(xt, ((0, 0), (0, B_pad - B)))
    xr = xt.reshape(3, R, 128)

    TR = _choose_block_rows(R, block_rows)
    grid = (pl.cdiv(R, TR),)                    # ragged final block is fine: the
                                                # padded rows/lanes are sliced off

    smem = pl.BlockSpec(memory_space=pltpu.MemorySpace.SMEM)

    out = pl.pallas_call(
        _mlp_kernel,
        out_shape=jax.ShapeDtypeStruct((R, 128), jnp.float32),
        grid=grid,
        in_specs=[
            smem,                                        # w1 (3,3)
            smem,                                        # b1 (3,)
            smem,                                        # w2 (3,)
            smem,                                        # b2 (1,)
            pl.BlockSpec((3, TR, 128), lambda i: (0, i, 0)),  # x (3, R, 128)
        ],
        out_specs=pl.BlockSpec((TR, 128), lambda i: (i, 0)),
        compiler_params=pltpu.CompilerParams(
            dimension_semantics=("parallel",),
            vmem_limit_bytes=32 * 1024 * 1024,
        ),
    )(w1.astype(jnp.float32),
      b1.reshape(3).astype(jnp.float32),
      w2.reshape(3).astype(jnp.float32),
      b2.reshape(1).astype(jnp.float32),
      xr)

    return out.reshape(B_pad, 1)[:B]            # (B, 1)


def _reference(x, w1, b1, w2, b2):
    # Pure-JAX reference (PyTorch semantics: y = x @ W^T + b).
    h = jnp.maximum(x @ w1.T + b1, 0.0)
    return h @ w2.T + b2


if __name__ == "__main__":
    key = jax.random.PRNGKey(0)
    kx, kp, kx2 = jax.random.split(key, 3)

    # Deterministic params mimicking nn.Linear default init, (out, in) layout.
    bound = 1.0 / jnp.sqrt(3.0)
    k1, k2, k3, k4 = jax.random.split(kp, 4)
    w1 = jax.random.uniform(k1, (3, 3), jnp.float32, -bound, bound)
    b1 = jax.random.uniform(k2, (3,), jnp.float32, -bound, bound)
    w2 = jax.random.uniform(k3, (1, 3), jnp.float32, -bound, bound)
    b2 = jax.random.uniform(k4, (1,), jnp.float32, -bound, bound)

    # Small batch: single (3, 1, 128) block.
    B = 8
    x = jax.random.normal(kx, (B, 3), jnp.float32)
    out = jax.block_until_ready(simple_net_forward(x, w1, b1, w2, b2))
    assert out.shape == (B, 1)
    assert jnp.allclose(out, _reference(x, w1, b1, w2, b2), atol=1e-5, rtol=1e-5)

    # Multi-block path with a ragged final block (R=9 rows, TR=8 -> grid of 2).
    B2 = 1100
    x2 = jax.random.normal(kx2, (B2, 3), jnp.float32)
    out2 = jax.block_until_ready(simple_net_forward(x2, w1, b1, w2, b2, block_rows=8))
    assert out2.shape == (B2, 1)
    assert jnp.allclose(out2, _reference(x2, w1, b1, w2, b2), atol=1e-5, rtol=1e-5)

    print("KERNEL_OK")
</pallas_src>

<mosaic_0001>
module attributes {stable_mosaic.version = 11 : i64} {
  func.func @_mlp_kernel(%arg0: i32, %arg1: memref<3x3xf32, #tpu.memory_space<smem>>, %arg2: memref<3xf32, #tpu.memory_space<smem>>, %arg3: memref<3xf32, #tpu.memory_space<smem>>, %arg4: memref<1xf32, #tpu.memory_space<smem>>, %arg5: memref<3x1x128xf32, #tpu.memory_space<vmem>>, %arg6: memref<1x128xf32, #tpu.memory_space<vmem>>) attributes {dimension_semantics = [#tpu.dimension_semantics<parallel>], iteration_bounds = array<i64: 1>, scalar_prefetch = 0 : i64, scratch_operands = 0 : i64, tpu.core_type = #tpu.core_type<tc>, window_params = [{transform_indices = @transform_0, window_bounds = array<i64: 3, 3>}, {transform_indices = @transform_1, window_bounds = array<i64: 3>}, {transform_indices = @transform_2, window_bounds = array<i64: 3>}, {transform_indices = @transform_3, window_bounds = array<i64: 1>}, {transform_indices = @transform_4, window_bounds = array<i64: 3, 1, 128>}, {transform_indices = @transform_5, window_bounds = array<i64: 1, 128>}]} {
    %c0 = arith.constant 0 : index
    %c0_0 = arith.constant 0 : index
    %c0_1 = arith.constant 0 : index
    %0 = vector.load %arg5[%c0, %c0_0, %c0_1] : memref<3x1x128xf32, #tpu.memory_space<vmem>>, vector<1x1x128xf32>
    %1 = vector.shape_cast %0 : vector<1x1x128xf32> to vector<1x128xf32>
    %c1 = arith.constant 1 : index
    %c0_2 = arith.constant 0 : index
    %c0_3 = arith.constant 0 : index
    %2 = vector.load %arg5[%c1, %c0_2, %c0_3] : memref<3x1x128xf32, #tpu.memory_space<vmem>>, vector<1x1x128xf32>
    %3 = vector.shape_cast %2 : vector<1x1x128xf32> to vector<1x128xf32>
    %c2 = arith.constant 2 : index
    %c0_4 = arith.constant 0 : index
    %c0_5 = arith.constant 0 : index
    %4 = vector.load %arg5[%c2, %c0_4, %c0_5] : memref<3x1x128xf32, #tpu.memory_space<vmem>>, vector<1x1x128xf32>
    %5 = vector.shape_cast %4 : vector<1x1x128xf32> to vector<1x128xf32>
    %c0_6 = arith.constant 0 : index
    %c0_7 = arith.constant 0 : index
    %6 = memref.load %arg1[%c0_6, %c0_7] : memref<3x3xf32, #tpu.memory_space<smem>>
    %7 = vector.broadcast %6 : f32 to vector<1x128xf32>
    %8 = arith.mulf %1, %7 : vector<1x128xf32>
    %c0_8 = arith.constant 0 : index
    %c1_9 = arith.constant 1 : index
    %9 = memref.load %arg1[%c0_8, %c1_9] : memref<3x3xf32, #tpu.memory_space<smem>>
    %10 = vector.broadcast %9 : f32 to vector<1x128xf32>
    %11 = arith.mulf %3, %10 : vector<1x128xf32>
    %12 = arith.addf %8, %11 : vector<1x128xf32>
    %c0_10 = arith.constant 0 : index
    %c2_11 = arith.constant 2 : index
    %13 = memref.load %arg1[%c0_10, %c2_11] : memref<3x3xf32, #tpu.memory_space<smem>>
    %14 = vector.broadcast %13 : f32 to vector<1x128xf32>
    %15 = arith.mulf %5, %14 : vector<1x128xf32>
    %16 = arith.addf %12, %15 : vector<1x128xf32>
    %c0_12 = arith.constant 0 : index
    %17 = memref.load %arg2[%c0_12] : memref<3xf32, #tpu.memory_space<smem>>
    %18 = vector.broadcast %17 : f32 to vector<1x128xf32>
    %19 = arith.addf %16, %18 : vector<1x128xf32>
    %cst = arith.constant 0.000000e+00 : f32
    %20 = vector.broadcast %cst : f32 to vector<1x128xf32>
    %21 = arith.maximumf %19, %20 : vector<1x128xf32>
    %c1_13 = arith.constant 1 : index
    %c0_14 = arith.constant 0 : index
    %22 = memref.load %arg1[%c1_13, %c0_14] : memref<3x3xf32, #tpu.memory_space<smem>>
    %23 = vector.broadcast %22 : f32 to vector<1x128xf32>
    %24 = arith.mulf %1, %23 : vector<1x128xf32>
    %c1_15 = arith.constant 1 : index
    %c1_16 = arith.constant 1 : index
    %25 = memref.load %arg1[%c1_15, %c1_16] : memref<3x3xf32, #tpu.memory_space<smem>>
    %26 = vector.broadcast %25 : f32 to vector<1x128xf32>
    %27 = arith.mulf %3, %26 : vector<1x128xf32>
    %28 = arith.addf %24, %27 : vector<1x128xf32>
    %c1_17 = arith.constant 1 : index
    %c2_18 = arith.constant 2 : index
    %29 = memref.load %arg1[%c1_17, %c2_18] : memref<3x3xf32, #tpu.memory_space<smem>>
    %30 = vector.broadcast %29 : f32 to vector<1x128xf32>
    %31 = arith.mulf %5, %30 : vector<1x128xf32>
    %32 = arith.addf %28, %31 : vector<1x128xf32>
    %c1_19 = arith.constant 1 : index
    %33 = memref.load %arg2[%c1_19] : memref<3xf32, #tpu.memory_space<smem>>
    %34 = vector.broadcast %33 : f32 to vector<1x128xf32>
    %35 = arith.addf %32, %34 : vector<1x128xf32>
    %cst_20 = arith.constant 0.000000e+00 : f32
    %36 = vector.broadcast %cst_20 : f32 to vector<1x128xf32>
    %37 = arith.maximumf %35, %36 : vector<1x128xf32>
    %c2_21 = arith.constant 2 : index
    %c0_22 = arith.constant 0 : index
    %38 = memref.load %arg1[%c2_21, %c0_22] : memref<3x3xf32, #tpu.memory_space<smem>>
    %39 = vector.broadcast %38 : f32 to vector<1x128xf32>
    %40 = arith.mulf %1, %39 : vector<1x128xf32>
    %c2_23 = arith.constant 2 : index
    %c1_24 = arith.constant 1 : index
    %41 = memref.load %arg1[%c2_23, %c1_24] : memref<3x3xf32, #tpu.memory_space<smem>>
    %42 = vector.broadcast %41 : f32 to vector<1x128xf32>
    %43 = arith.mulf %3, %42 : vector<1x128xf32>
    %44 = arith.addf %40, %43 : vector<1x128xf32>
    %c2_25 = arith.constant 2 : index
    %c2_26 = arith.constant 2 : index
    %45 = memref.load %arg1[%c2_25, %c2_26] : memref<3x3xf32, #tpu.memory_space<smem>>
    %46 = vector.broadcast %45 : f32 to vector<1x128xf32>
    %47 = arith.mulf %5, %46 : vector<1x128xf32>
    %48 = arith.addf %44, %47 : vector<1x128xf32>
    %c2_27 = arith.constant 2 : index
    %49 = memref.load %arg2[%c2_27] : memref<3xf32, #tpu.memory_space<smem>>
    %50 = vector.broadcast %49 : f32 to vector<1x128xf32>
    %51 = arith.addf %48, %50 : vector<1x128xf32>
    %cst_28 = arith.constant 0.000000e+00 : f32
    %52 = vector.broadcast %cst_28 : f32 to vector<1x128xf32>
    %53 = arith.maximumf %51, %52 : vector<1x128xf32>
    %c0_29 = arith.constant 0 : index
    %54 = memref.load %arg3[%c0_29] : memref<3xf32, #tpu.memory_space<smem>>
    %55 = vector.broadcast %54 : f32 to vector<1x128xf32>
    %56 = arith.mulf %21, %55 : vector<1x128xf32>
    %c1_30 = arith.constant 1 : index
    %57 = memref.load %arg3[%c1_30] : memref<3xf32, #tpu.memory_space<smem>>
    %58 = vector.broadcast %57 : f32 to vector<1x128xf32>
    %59 = arith.mulf %37, %58 : vector<1x128xf32>
    %60 = arith.addf %56, %59 : vector<1x128xf32>
    %c2_31 = arith.constant 2 : index
    %61 = memref.load %arg3[%c2_31] : memref<3xf32, #tpu.memory_space<smem>>
    %62 = vector.broadcast %61 : f32 to vector<1x128xf32>
    %63 = arith.mulf %53, %62 : vector<1x128xf32>
    %64 = arith.addf %60, %63 : vector<1x128xf32>
    %c0_32 = arith.constant 0 : index
    %65 = memref.load %arg4[%c0_32] : memref<1xf32, #tpu.memory_space<smem>>
    %66 = vector.broadcast %65 : f32 to vector<1x128xf32>
    %67 = arith.addf %64, %66 : vector<1x128xf32>
    %c0_33 = arith.constant 0 : index
    %c0_34 = arith.constant 0 : index
    %68 = vector.load %arg6[%c0_33, %c0_34] : memref<1x128xf32, #tpu.memory_space<vmem>>, vector<1x128xf32>
    tpu.vector_store %arg6[%c0_33, %c0_34], %67 {strides = array<i32>} : memref<1x128xf32, #tpu.memory_space<vmem>>, vector<1x128xf32>,
    return
  }
  func.func @transform_0(%arg0: i32) -> (i32, i32) {
    %c0_i32 = arith.constant 0 : i32
    %c0_i32_0 = arith.constant 0 : i32
    %c0_i32_1 = arith.constant 0 : i32
    return %c0_i32, %c0_i32_0 : i32, i32
  }
  func.func @transform_1(%arg0: i32) -> i32 {
    %c0_i32 = arith.constant 0 : i32
    %c0_i32_0 = arith.constant 0 : i32
    return %c0_i32 : i32
  }
  func.func @transform_2(%arg0: i32) -> i32 {
    %c0_i32 = arith.constant 0 : i32
    %c0_i32_0 = arith.constant 0 : i32
    return %c0_i32 : i32
  }
  func.func @transform_3(%arg0: i32) -> i32 {
    %c0_i32 = arith.constant 0 : i32
    %c0_i32_0 = arith.constant 0 : i32
    return %c0_i32 : i32
  }
  func.func @transform_4(%arg0: i32) -> (i32, i32, i32) {
    %c0_i32 = arith.constant 0 : i32
    %c0_i32_0 = arith.constant 0 : i32
    %c0_i32_1 = arith.constant 0 : i32
    return %c0_i32, %arg0, %c0_i32_0 : i32, i32, i32
  }
  func.func @transform_5(%arg0: i32) -> (i32, i32) {
    %c0_i32 = arith.constant 0 : i32
    %c0_i32_0 = arith.constant 0 : i32
    return %arg0, %c0_i32 : i32, i32
  }
}

</mosaic_0001>

<bundles_post_ra>
// kernel: simple_net_forward.1
= control target key start
LH: loop header
LB: loop body
LE: loop exit
PB: predicated region body
PF: predicated region fallthrough
CT: control target
= control target key end

     0   :  { %11 = vsyncpa [#allocation4], 0  ;;  %s245_s0 = inlined_call_operand.vmem [shape: f32[3,3], index: 0, kind: input, shape index: {}]   ;;  %s246_s1 = inlined_call_operand.vmem [shape: f32[3], index: 1, kind: input, shape index: {}]   ;;  %s247_s2 = inlined_call_operand.vmem [shape: f32[3], index: 2, kind: input, shape index: {}]   ;;  %s248_s3 = inlined_call_operand.<no memory space> [shape: f32[1], index: 3, kind: input, shape index: {}]   ;;  %s249_s4 = inlined_call_operand.vmem [shape: f32[3,1,128], index: 4, kind: input, shape index: {}]   ;;  %s250_s5 = inlined_call_operand.vmem [shape: f32[1,128], index: 5, kind: output, shape index: {}]  }
   0x1   :  { %12 = vsyncpa [#allocation6], 0  ;;  %s27_s20 = sshll.u32 %s246_s1, 4  ;;  %s18_s23 = sshll.u32 %s245_s0, 4  ;;  %s28_s20 = int_to_ptr.vmem [resolvable:$true] %s27_s20  ;;  %s19_s23 = int_to_ptr.vmem [resolvable:$true] %s18_s23 }
   0x2   :  { %s185_s24 = smov [#allocation5]   ;;  %s186_s25 = smov [#allocation3]  }
   0x3   :  { %30 = dma.vmem_to_smem %s28_s20, 16, %s185_s24, [#allocation6]  }
   0x4   :  { %21 = dma.vmem_to_smem %s19_s23, 64, %s186_s25, [#allocation4]  }
   0x5   :  { %s36_s28 = sshll.u32 %s247_s2, 4  ;;  %s187_s29 = smov [#allocation7]   ;;  %s37_s28 = int_to_ptr.vmem [resolvable:$true] %s36_s28 }
   0x6   :  { %39 = dma.vmem_to_smem %s37_s28, 16, %s187_s29, [#allocation6]  }
   0x7   :  { %181 = dma.done.wait [#allocation4], 64  }
   0x8   :  { %182 = vsyncadd [#allocation4], 4294967232 }
   0x9   :  { %183 = dma.done.wait [#allocation6], 32  }
   0xa   :  { %184 = vsyncadd [#allocation6], 4294967264 }
   0xb   :  { %56 = sfence }
   0xc   :  { %s62_s1 = sld [smem:[#allocation3]]  ;;  %v57_v0 = vld [vmem:[%s249_s4] sm:$0x1]  ;;  %v128_v1 = vld [vmem:[%s249_s4 + $0x1] sm:$0x1]  ;;  %v119_v43 = vstv %s248_s3 }
   0xd   :  { %s130_s30 = sld [smem:[#allocation3 + $0x1]]  ;;  %v129_v2 = vld [vmem:[%s249_s4 + $0x2] sm:$0x1] }
   0xe   :  { %s131_s0 = sld [smem:[#allocation3 + $0x2]] }
   0xf   :  { %s73_s6 = sld [smem:[#allocation5]] }
  0x10   :  { %s132_s9 = sld [smem:[#allocation3 + $0x80]] }
  0x11   :  { %s133_s2 = sld [smem:[#allocation3 + $0x81]] }
  0x12   :  { %v63_v3 = vstv %s62_s1  ;;  %s134_s14 = sld [smem:[#allocation3 + $0x82]] }
  0x13   :  { %v64_v4 = vmul.f32 %v63_v3, %v57_v0  ;;  %v66_v5 = vstv %s130_s30  ;;  %s236_s15 = sld [smem:[#allocation5 + $0x1]] }
  0x14   :  { %v67_v6 = vmul.f32 %v128_v1, %v66_v5  ;;  %v70_v7 = vstv %s131_s0  ;;  %s136_s16 = sld [smem:[#allocation3 + $0x100]] }
  0x15   :  { %v71_v8 = vmul.f32 %v129_v2, %v70_v7  ;;  %s137_s17 = sld [smem:[#allocation3 + $0x101]]  ;;  %v74_v11 = vstv %s73_s6 }
  0x16   :  { %v68_v9 = vadd.f32 %v67_v6, %v64_v4  ;;  %v78_v10 = vstv %s132_s9  ;;  %s138_s18 = sld [smem:[#allocation3 + $0x102]] }
  0x17   :  { %v79_v12 = vmul.f32 %v78_v10, %v57_v0  ;;  %v81_v13 = vstv %s133_s2  ;;  %s139_s19 = sld [smem:[#allocation5 + $0x2]] }
  0x18   :  { %v72_v14 = vadd.f32 %v71_v8, %v68_v9  ;;  %v82_v15 = vmul.f32 %v128_v1, %v81_v13  ;;  %v85_v16 = vstv %s134_s14  ;;  %s107_s4 = sld [smem:[#allocation7]] }
  0x19   :  { %v86_v17 = vmul.f32 %v129_v2, %v85_v16  ;;  %s140_s20 = sld [smem:[#allocation7 + $0x1]]  ;;  %v89_v21 = vstv %s236_s15 }
  0x1a   :  { %v75_v18 = vadd.f32 %v74_v11, %v72_v14  ;;  %v83_v19 = vadd.f32 %v82_v15, %v79_v12  ;;  %v93_v20 = vstv %s136_s16  ;;  %s141_s21 = sld [smem:[#allocation7 + $0x2]] }
  0x1b   :  { %v94_v22 = vmul.f32 %v93_v20, %v57_v0  ;;  %v96_v23 = vstv %s137_s17 }
  0x1c   :  { %v76_v24 = vmax.f32 %v75_v18, 0.0  ;;  %v87_v25 = vadd.f32 %v86_v17, %v83_v19  ;;  %v97_v26 = vmul.f32 %v128_v1, %v96_v23  ;;  %v100_v27 = vstv %s138_s18 }
  0x1d   :  { %v101_v28 = vmul.f32 %v129_v2, %v100_v27  ;;  %v104_v32 = vstv %s139_s19 }
  0x1e   :  { %v90_v29 = vadd.f32 %v89_v21, %v87_v25  ;;  %v98_v30 = vadd.f32 %v97_v26, %v94_v22  ;;  %v108_v31 = vstv %s107_s4 }
  0x1f   :  { %v111_v33 = vstv %s140_s20  ;;  %v109_v36 = vmul.f32 %v108_v31, %v76_v24 }
  0x20   :  { %v91_v34 = vmax.f32 %v90_v29, 0.0  ;;  %v102_v35 = vadd.f32 %v101_v28, %v98_v30  ;;  %v115_v39 = vstv %s141_s21 }
  0x22   :  { %v105_v37 = vadd.f32 %v104_v32, %v102_v35  ;;  %v112_v38 = vmul.f32 %v111_v33, %v91_v34 }
  0x24   :  { %v106_v40 = vmax.f32 %v105_v37, 0.0  ;;  %v113_v41 = vadd.f32 %v112_v38, %v109_v36 }
  0x26   :  { %v116_v42 = vmul.f32 %v115_v39, %v106_v40 }
  0x28   :  { %v117_v44 = vadd.f32 %v116_v42, %v113_v41 }
  0x2a   :  { %v120_v45 = vadd.f32 %v119_v43, %v117_v44 }
  0x2c   :  { %121 = vst [vmem:[%s250_s5] sm:$0x1] %v120_v45 }
  0x2d   :  { %126 = vsyncpa [#allocation4], 1 }
  0x2e   :  { %127 = vsyncpa [#allocation6], 1 }

</bundles_post_ra>
